<compile_context>
chip_gen: v5e
topology: v5e:2x2
jax: 0.10.0
libtpu: 0.0.40
codegen_flags: <defaults>
</compile_context>

<pallas_src>
import jax
import jax.numpy as jnp
import numpy as np
from jax.experimental import pallas as pl
from jax.experimental.pallas import tpu as pltpu

# Logical (PyTorch) dims
IN_DIM, H1, H2, OUT_DIM = 3, 200, 100, 1
# Padded (TPU-aligned) dims
IN_P, H1_P, H2_P, OUT_P = 8, 256, 128, 128
TB_MAX = 256  # max batch-tile rows per grid step


def _round_up(n, m):
    return ((n + m - 1) // m) * m


def _policy_mlp_kernel(x_ref, w1_ref, b1_ref, w2_ref, b2_ref, w3_ref, b3_ref, o_ref):
    # Full forward pass for one batch tile, entirely in VMEM / on the MXU+VPU.
    x = x_ref[...]                                                    # (TB, IN_P)
    h1 = jnp.dot(x, w1_ref[...], preferred_element_type=jnp.float32) + b1_ref[...]
    h1 = jnp.maximum(h1, 0.0)                                         # ReLU
    h2 = jnp.dot(h1, w2_ref[...], preferred_element_type=jnp.float32) + b2_ref[...]
    h2 = jnp.maximum(h2, 0.0)                                         # ReLU
    y = jnp.dot(h2, w3_ref[...], preferred_element_type=jnp.float32) + b3_ref[...]
    o_ref[...] = 2.0 * jnp.tanh(y)                                    # mean head


def pad_params(params):
    """One-time padding of parameters into TPU-aligned slabs.

    Hoisted out of the hot path: call once after init / checkpoint load and
    reuse the padded slabs for every forward call.
    """
    w1, b1, w2, b2, w3, b3 = params
    w1_p = jnp.zeros((IN_P, H1_P), jnp.float32).at[:IN_DIM, :H1].set(w1)
    b1_p = jnp.zeros((1, H1_P), jnp.float32).at[0, :H1].set(b1)
    w2_p = jnp.zeros((H1_P, H2_P), jnp.float32).at[:H1, :H2].set(w2)
    b2_p = jnp.zeros((1, H2_P), jnp.float32).at[0, :H2].set(b2)
    w3_p = jnp.zeros((H2_P, OUT_P), jnp.float32).at[:H2, :OUT_DIM].set(w3)
    b3_p = jnp.zeros((1, OUT_P), jnp.float32).at[0, :OUT_DIM].set(b3)
    return (w1_p, b1_p, w2_p, b2_p, w3_p, b3_p)


def policy_net_forward(x, padded_params):
    """x: [B, 3] float32 -> mean: [B, 1] float32."""
    w1_p, b1_p, w2_p, b2_p, w3_p, b3_p = padded_params
    B = x.shape[0]

    # Batch tile: as large as possible up to TB_MAX. Keeps per-step pipeline
    # overhead negligible and the MXU well fed; for B >= 2*TB_MAX the grid has
    # >= 2 parallel steps so both v7x TensorCores get work.
    TB = min(TB_MAX, _round_up(B, 8))
    B_pad = _round_up(B, TB)

    # Pad input only to 8 feature lanes (not 128): ~16x less HBM read traffic
    # for the activation stream. Zero pad rows/cols flow through relu/tanh as
    # exact zeros and are sliced off below, so numerics are unchanged.
    x_p = jnp.zeros((B_pad, IN_P), jnp.float32).at[:B, :IN_DIM].set(x)

    grid = (B_pad // TB,)
    full = lambda i: (0, 0)  # weights/biases: same (whole) block for every tile

    out_p = pl.pallas_call(
        _policy_mlp_kernel,
        out_shape=jax.ShapeDtypeStruct((B_pad, OUT_P), jnp.float32),
        grid_spec=pltpu.PrefetchScalarGridSpec(
            num_scalar_prefetch=0,
            grid=grid,
            in_specs=[
                pl.BlockSpec((TB, IN_P), lambda i: (i, 0)),
                pl.BlockSpec((IN_P, H1_P), full),
                pl.BlockSpec((1, H1_P), full),
                pl.BlockSpec((H1_P, H2_P), full),
                pl.BlockSpec((1, H2_P), full),
                pl.BlockSpec((H2_P, OUT_P), full),
                pl.BlockSpec((1, OUT_P), full),
            ],
            out_specs=pl.BlockSpec((TB, OUT_P), lambda i: (i, 0)),
        ),
        compiler_params=pltpu.CompilerParams(
            dimension_semantics=("parallel",),
        ),
    )(x_p, w1_p, b1_p, w2_p, b2_p, w3_p, b3_p)

    return out_p[:B, :OUT_DIM]


def init_params(key):
    """Deterministic init mimicking nn.Linear's U(-1/sqrt(fan_in), 1/sqrt(fan_in))."""
    ks = jax.random.split(key, 6)

    def lin(kw, kb, fan_in, fan_out):
        bound = 1.0 / np.sqrt(fan_in)
        w = jax.random.uniform(kw, (fan_in, fan_out), jnp.float32, -bound, bound)
        b = jax.random.uniform(kb, (fan_out,), jnp.float32, -bound, bound)
        return w, b

    w1, b1 = lin(ks[0], ks[1], IN_DIM, H1)
    w2, b2 = lin(ks[2], ks[3], H1, H2)
    w3, b3 = lin(ks[4], ks[5], H2, OUT_DIM)
    return (w1, b1, w2, b2, w3, b3)


def reference_forward(x, params):
    w1, b1, w2, b2, w3, b3 = params
    hp = jax.lax.Precision.HIGHEST
    h1 = jnp.maximum(jnp.dot(x, w1, precision=hp) + b1, 0.0)
    h2 = jnp.maximum(jnp.dot(h1, w2, precision=hp) + b2, 0.0)
    return 2.0 * jnp.tanh(jnp.dot(h2, w3, precision=hp) + b3)


if __name__ == "__main__":
    key = jax.random.PRNGKey(0)
    k_param, k_x1, k_x2 = jax.random.split(key, 3)
    params = init_params(k_param)
    padded_params = pad_params(params)   # hoisted: done once, not per forward

    fwd = jax.jit(policy_net_forward)

    # Small batch of 3-dim states (single grid step).
    B1 = 8
    x1 = jax.random.normal(k_x1, (B1, IN_DIM), jnp.float32)
    out1 = jax.block_until_ready(fwd(x1, padded_params))
    assert out1.shape == (B1, OUT_DIM)
    np.testing.assert_allclose(np.asarray(out1),
                               np.asarray(reference_forward(x1, params)),
                               rtol=1e-5, atol=1e-5)

    # Larger batch exercising a multi-step grid (TB=256, 2 tiles) and the
    # zero-padded tail rows.
    B2 = 300
    x2 = jax.random.normal(k_x2, (B2, IN_DIM), jnp.float32)
    out2 = jax.block_until_ready(fwd(x2, padded_params))
    assert out2.shape == (B2, OUT_DIM)
    np.testing.assert_allclose(np.asarray(out2),
                               np.asarray(reference_forward(x2, params)),
                               rtol=1e-5, atol=1e-5)

    print("KERNEL_OK")
</pallas_src>

<mosaic_0001>
module attributes {stable_mosaic.version = 11 : i64} {
  func.func @_policy_mlp_kernel(%arg0: i32, %arg1: memref<8x8xf32, #tpu.memory_space<vmem>>, %arg2: memref<8x256xf32, #tpu.memory_space<vmem>>, %arg3: memref<1x256xf32, #tpu.memory_space<vmem>>, %arg4: memref<256x128xf32, #tpu.memory_space<vmem>>, %arg5: memref<1x128xf32, #tpu.memory_space<vmem>>, %arg6: memref<128x128xf32, #tpu.memory_space<vmem>>, %arg7: memref<1x128xf32, #tpu.memory_space<vmem>>, %arg8: memref<8x128xf32, #tpu.memory_space<vmem>>) attributes {dimension_semantics = [#tpu.dimension_semantics<parallel>], iteration_bounds = array<i64: 1>, scalar_prefetch = 0 : i64, scratch_operands = 0 : i64, tpu.core_type = #tpu.core_type<tc>, window_params = [{transform_indices = @transform_0, window_bounds = array<i64: 8, 8>}, {pipeline_mode = #tpu.pipeline_mode<synchronous>, transform_indices = @transform_1, window_bounds = array<i64: 8, 256>}, {pipeline_mode = #tpu.pipeline_mode<synchronous>, transform_indices = @transform_2, window_bounds = array<i64: 1, 256>}, {pipeline_mode = #tpu.pipeline_mode<synchronous>, transform_indices = @transform_3, window_bounds = array<i64: 256, 128>}, {pipeline_mode = #tpu.pipeline_mode<synchronous>, transform_indices = @transform_4, window_bounds = array<i64: 1, 128>}, {pipeline_mode = #tpu.pipeline_mode<synchronous>, transform_indices = @transform_5, window_bounds = array<i64: 128, 128>}, {pipeline_mode = #tpu.pipeline_mode<synchronous>, transform_indices = @transform_6, window_bounds = array<i64: 1, 128>}, {transform_indices = @transform_7, window_bounds = array<i64: 8, 128>}]} {
    %c0 = arith.constant 0 : index
    %c0_0 = arith.constant 0 : index
    %0 = vector.load %arg1[%c0, %c0_0] : memref<8x8xf32, #tpu.memory_space<vmem>>, vector<8x8xf32>
    %c0_1 = arith.constant 0 : index
    %c0_2 = arith.constant 0 : index
    %1 = vector.load %arg2[%c0_1, %c0_2] : memref<8x256xf32, #tpu.memory_space<vmem>>, vector<8x256xf32>
    %cst = arith.constant dense<0.000000e+00> : vector<8x256xf32>
    %2 = tpu.matmul %0, %1, %cst {dimension_numbers = #tpu.dot_dimension_numbers<[1], [0], [0], [1], [0, 0, 1, 1], [], []>} : vector<8x8xf32>, vector<8x256xf32>, vector<8x256xf32> -> vector<8x256xf32>
    %c0_3 = arith.constant 0 : index
    %c0_4 = arith.constant 0 : index
    %3 = vector.load %arg3[%c0_3, %c0_4] : memref<1x256xf32, #tpu.memory_space<vmem>>, vector<1x256xf32>
    %4 = vector.broadcast %3 : vector<1x256xf32> to vector<8x256xf32>
    %5 = arith.addf %2, %4 : vector<8x256xf32>
    %cst_5 = arith.constant 0.000000e+00 : f32
    %6 = vector.broadcast %cst_5 : f32 to vector<8x256xf32>
    %7 = arith.maximumf %5, %6 : vector<8x256xf32>
    %c0_6 = arith.constant 0 : index
    %c0_7 = arith.constant 0 : index
    %8 = vector.load %arg4[%c0_6, %c0_7] : memref<256x128xf32, #tpu.memory_space<vmem>>, vector<256x128xf32>
    %cst_8 = arith.constant dense<0.000000e+00> : vector<8x128xf32>
    %9 = tpu.matmul %7, %8, %cst_8 {dimension_numbers = #tpu.dot_dimension_numbers<[1], [0], [0], [1], [0, 0, 1, 1], [], []>} : vector<8x256xf32>, vector<256x128xf32>, vector<8x128xf32> -> vector<8x128xf32>
    %c0_9 = arith.constant 0 : index
    %c0_10 = arith.constant 0 : index
    %10 = vector.load %arg5[%c0_9, %c0_10] : memref<1x128xf32, #tpu.memory_space<vmem>>, vector<1x128xf32>
    %11 = vector.broadcast %10 : vector<1x128xf32> to vector<8x128xf32>
    %12 = arith.addf %9, %11 : vector<8x128xf32>
    %cst_11 = arith.constant 0.000000e+00 : f32
    %13 = vector.broadcast %cst_11 : f32 to vector<8x128xf32>
    %14 = arith.maximumf %12, %13 : vector<8x128xf32>
    %c0_12 = arith.constant 0 : index
    %c0_13 = arith.constant 0 : index
    %15 = vector.load %arg6[%c0_12, %c0_13] : memref<128x128xf32, #tpu.memory_space<vmem>>, vector<128x128xf32>
    %cst_14 = arith.constant dense<0.000000e+00> : vector<8x128xf32>
    %16 = tpu.matmul %14, %15, %cst_14 {dimension_numbers = #tpu.dot_dimension_numbers<[1], [0], [0], [1], [0, 0, 1, 1], [], []>} : vector<8x128xf32>, vector<128x128xf32>, vector<8x128xf32> -> vector<8x128xf32>
    %c0_15 = arith.constant 0 : index
    %c0_16 = arith.constant 0 : index
    %17 = vector.load %arg7[%c0_15, %c0_16] : memref<1x128xf32, #tpu.memory_space<vmem>>, vector<1x128xf32>
    %18 = vector.broadcast %17 : vector<1x128xf32> to vector<8x128xf32>
    %19 = arith.addf %16, %18 : vector<8x128xf32>
    %20 = math.tanh %19 : vector<8x128xf32>
    %cst_17 = arith.constant 2.000000e+00 : f32
    %21 = vector.broadcast %cst_17 : f32 to vector<8x128xf32>
    %22 = arith.mulf %21, %20 : vector<8x128xf32>
    %c0_18 = arith.constant 0 : index
    %c0_19 = arith.constant 0 : index
    %23 = vector.load %arg8[%c0_18, %c0_19] : memref<8x128xf32, #tpu.memory_space<vmem>>, vector<8x128xf32>
    tpu.vector_store %arg8[%c0_18, %c0_19], %22 {strides = array<i32>} : memref<8x128xf32, #tpu.memory_space<vmem>>, vector<8x128xf32>,
    return
  }
  func.func @transform_0(%arg0: i32) -> (i32, i32) {
    %c0_i32 = arith.constant 0 : i32
    %c0_i32_0 = arith.constant 0 : i32
    return %arg0, %c0_i32 : i32, i32
  }
  func.func @transform_1(%arg0: i32) -> (i32, i32) {
    %c0_i32 = arith.constant 0 : i32
    %c0_i32_0 = arith.constant 0 : i32
    %c0_i32_1 = arith.constant 0 : i32
    return %c0_i32, %c0_i32_0 : i32, i32
  }
  func.func @transform_2(%arg0: i32) -> (i32, i32) {
    %c0_i32 = arith.constant 0 : i32
    %c0_i32_0 = arith.constant 0 : i32
    %c0_i32_1 = arith.constant 0 : i32
    return %c0_i32, %c0_i32_0 : i32, i32
  }
  func.func @transform_3(%arg0: i32) -> (i32, i32) {
    %c0_i32 = arith.constant 0 : i32
    %c0_i32_0 = arith.constant 0 : i32
    %c0_i32_1 = arith.constant 0 : i32
    return %c0_i32, %c0_i32_0 : i32, i32
  }
  func.func @transform_4(%arg0: i32) -> (i32, i32) {
    %c0_i32 = arith.constant 0 : i32
    %c0_i32_0 = arith.constant 0 : i32
    %c0_i32_1 = arith.constant 0 : i32
    return %c0_i32, %c0_i32_0 : i32, i32
  }
  func.func @transform_5(%arg0: i32) -> (i32, i32) {
    %c0_i32 = arith.constant 0 : i32
    %c0_i32_0 = arith.constant 0 : i32
    %c0_i32_1 = arith.constant 0 : i32
    return %c0_i32, %c0_i32_0 : i32, i32
  }
  func.func @transform_6(%arg0: i32) -> (i32, i32) {
    %c0_i32 = arith.constant 0 : i32
    %c0_i32_0 = arith.constant 0 : i32
    %c0_i32_1 = arith.constant 0 : i32
    return %c0_i32, %c0_i32_0 : i32, i32
  }
  func.func @transform_7(%arg0: i32) -> (i32, i32) {
    %c0_i32 = arith.constant 0 : i32
    %c0_i32_0 = arith.constant 0 : i32
    return %arg0, %c0_i32 : i32, i32
  }
}

</mosaic_0001>

<bundles_post_ra>
// kernel: policy_net_forward.1
= control target key start
LH: loop header
LB: loop body
LE: loop exit
PB: predicated region body
PF: predicated region fallthrough
CT: control target
= control target key end

     0   :  { %12 = vsyncpa [#allocation3], 0  ;;  %s374_s0 = inlined_call_operand.vmem [shape: f32[8,8], index: 0, kind: input, shape index: {}]   ;;  %s375_s1 = inlined_call_operand.vmem [shape: f32[8,256], index: 1, kind: input, shape index: {}]   ;;  %s376_s2 = inlined_call_operand.vmem [shape: f32[1,256], index: 2, kind: input, shape index: {}]   ;;  %s377_s3 = inlined_call_operand.hbm [shape: f32[256,128], index: 3, kind: input, shape index: {}]   ;;  %s378_s4 = inlined_call_operand.vmem [shape: f32[1,128], index: 4, kind: input, shape index: {}]   ;;  %s379_s5 = inlined_call_operand.hbm [shape: f32[128,128], index: 5, kind: input, shape index: {}]   ;;  %s380_s6 = inlined_call_operand.vmem [shape: f32[1,128], index: 6, kind: input, shape index: {}]   ;;  %s381_s7 = inlined_call_operand.vmem [shape: f32[8,128], index: 7, kind: output, shape index: {}]  }
   0x1   :  { %s24_s26 = sshll.u32 %s377_s3, 4  ;;  %s25_s26 = int_to_ptr.hbm [resolvable:$true] %s24_s26 }
   0x2   :  { %13 = vsyncpa [#allocation5], 0  ;;  %s301_s27 = smov [#allocation2]   ;;  %s39_s8 = sshll.u32 %s379_s5, 4  ;;  %s40_s8 = int_to_ptr.hbm [resolvable:$true] %s39_s8 }
   0x3   :  { %s26_s28 = sshll.u32 %s301_s27, 4  ;;  %s302_s9 = smov 128   ;;  %s27_s28 = int_to_ptr.vmem [resolvable:$true] %s26_s28 }
   0x4   :  { %s303_s10 = smov 8   ;;  %s304_s11 = smov [#allocation4]  }
   0x5   :  { %32 = dma.hbm_to_vmem [thread:$0]  %s25_s26, 4096, %s27_s28, [#allocation3], %s302_s9, %s302_s9, %s303_s10  }
   0x6   :  { %s41_s12 = sshll.u32 %s304_s11, 4  ;;  %s42_s12 = int_to_ptr.vmem [resolvable:$true] %s41_s12 }
   0x7   :  { %47 = dma.hbm_to_vmem [thread:$0]  %s40_s8, 2048, %s42_s12, [#allocation5], %s302_s9, %s302_s9, %s303_s10  }
   0x8   :  { %297 = dma.done.wait [#allocation3], 4096  }
   0x9   :  { %298 = vsyncadd [#allocation3], 4294963200 }
   0xa   :  { %299 = dma.done.wait [#allocation5], 2048  }
   0xb   :  { %300 = vsyncadd [#allocation5], 4294965248  ;;  %vm67_vm0 = vcmask 64512   ;;  %v59_v0 = vld [vmem:[%s375_s1] sm:$0xff]  ;;  %v60_v2 = vld [vmem:[%s375_s1 + $0x8] sm:$0xff] }
   0xc   :  { %v58_v1 = vld [vmem:[%s374_s0] sm:$0xff]  ;;  %86 = vmatpush.msra.mxu1 %v59_v0  ;;  %v128_v3 = vld [vmem:[#allocation2 + $0x78] sm:$0xff]  ;;  %v127_v4 = vld [vmem:[#allocation2 + $0x70] sm:$0xff] }
   0xd   :  { %239 = vmatmul.msk.f32.vlgmr.msra.gmra.mxu1 %vm67_vm0, %v58_v1  ;;  %149 = vmatpush.msra.mxu2 %v128_v3  ;;  %v144_v5 = vld [vmem:[#allocation2 + $0xf8] sm:$0xff]  ;;  %v126_v6 = vld [vmem:[#allocation2 + $0x68] sm:$0xff]  ;;  %v143_v7 = vld [vmem:[#allocation2 + $0xf0] sm:$0xff] }
   0xe   :  { %106 = vmatpush.msrb.mxu1 %v60_v2  ;;  %169 = vmatpush.msra.mxu3 %v144_v5  ;;  %v142_v8 = vld [vmem:[#allocation2 + $0xe8] sm:$0xff]  ;;  %v125_v9 = vld [vmem:[#allocation2 + $0x60] sm:$0xff]  ;;  %v124_v11 = vld [vmem:[#allocation2 + $0x58] sm:$0xff] }
   0xf   :  { %150 = vmatpush.msra.mxu2 %v127_v4  ;;  %v141_v10 = vld [vmem:[#allocation2 + $0xe0] sm:$0xff]  ;;  %v140_v12 = vld [vmem:[#allocation2 + $0xd8] sm:$0xff]  ;;  %v123_v13 = vld [vmem:[#allocation2 + $0x50] sm:$0xff] }
  0x10   :  { %170 = vmatpush.msra.mxu3 %v143_v7  ;;  %v139_v14 = vld [vmem:[#allocation2 + $0xd0] sm:$0xff]  ;;  %v122_v15 = vld [vmem:[#allocation2 + $0x48] sm:$0xff]  ;;  %v121_v17 = vld [vmem:[#allocation2 + $0x40] sm:$0xff] }
  0x11   :  { %151 = vmatpush.msra.mxu2 %v126_v6  ;;  %v138_v16 = vld [vmem:[#allocation2 + $0xc8] sm:$0xff]  ;;  %v137_v18 = vld [vmem:[#allocation2 + $0xc0] sm:$0xff]  ;;  %v120_v19 = vld [vmem:[#allocation2 + $0x38] sm:$0xff] }
  0x12   :  { %171 = vmatpush.msra.mxu3 %v142_v8  ;;  %v136_v20 = vld [vmem:[#allocation2 + $0xb8] sm:$0xff]  ;;  %v119_v21 = vld [vmem:[#allocation2 + $0x30] sm:$0xff]  ;;  %v118_v22 = vld [vmem:[#allocation2 + $0x28] sm:$0xff] }
  0x13   :  { %152 = vmatpush.msra.mxu2 %v125_v9  ;;  %v117_v23 = vld [vmem:[#allocation2 + $0x20] sm:$0xff]  ;;  %v116_v24 = vld [vmem:[#allocation2 + $0x18] sm:$0xff]  ;;  %v115_v25 = vld [vmem:[#allocation2 + $0x10] sm:$0xff] }
  0x14   :  { %172 = vmatpush.msra.mxu3 %v141_v10  ;;  %v135_v26 = vld [vmem:[#allocation2 + $0xb0] sm:$0xff]  ;;  %v114_v27 = vld [vmem:[#allocation2 + $0x8] sm:$0xff]  ;;  %v113_v29 = vld [vmem:[#allocation2] sm:$0xff] }
  0x15   :  { %240 = vmatmul.msk.f32.vlgmr.msrb.gmra.mxu1 %vm67_vm0, %v58_v1  ;;  %153 = vmatpush.msra.mxu2 %v124_v11  ;;  %v134_v28 = vld [vmem:[#allocation2 + $0xa8] sm:$0xff]  ;;  %v133_v30 = vld [vmem:[#allocation2 + $0xa0] sm:$0xff]  ;;  %v132_v31 = vld [vmem:[#allocation2 + $0x98] sm:$0xff] }
  0x16   :  { %173 = vmatpush.msra.mxu3 %v140_v12  ;;  %v131_v32 = vld [vmem:[#allocation2 + $0x90] sm:$0xff]  ;;  %v130_v33 = vld [vmem:[#allocation2 + $0x88] sm:$0xff]  ;;  %v129_v34 = vld [vmem:[#allocation2 + $0x80] sm:$0xff] }
  0x17   :  { %154 = vmatpush.msra.mxu2 %v123_v13  ;;  %v205_v35 = vld [vmem:[#allocation4 + $0x78] sm:$0xff]  ;;  %v204_v36 = vld [vmem:[#allocation4 + $0x70] sm:$0xff]  ;;  %v203_v37 = vld [vmem:[#allocation4 + $0x68] sm:$0xff] }
  0x18   :  { %174 = vmatpush.msra.mxu3 %v139_v14  ;;  %210 = vmatpush.msra.mxu0 %v205_v35  ;;  %v202_v38 = vld [vmem:[#allocation4 + $0x60] sm:$0xff]  ;;  %v201_v39 = vld [vmem:[#allocation4 + $0x58] sm:$0xff]  ;;  %v200_v40 = vld [vmem:[#allocation4 + $0x50] sm:$0xff] }
  0x19   :  { %155 = vmatpush.msra.mxu2 %v122_v15  ;;  %v199_v41 = vld [vmem:[#allocation4 + $0x48] sm:$0xff]  ;;  %v198_v42 = vld [vmem:[#allocation4 + $0x40] sm:$0xff]  ;;  %v197_v44 = vld [vmem:[#allocation4 + $0x38] sm:$0xff] }
  0x1a   :  { %175 = vmatpush.msra.mxu3 %v138_v16  ;;  %211 = vmatpush.msra.mxu0 %v204_v36  ;;  %v61_v43 = vld [vmem:[%s376_s2] sm:$0x3]  ;;  %v196_v53 = vld [vmem:[#allocation4 + $0x30] sm:$0xff]  ;;  %v195_v54 = vld [vmem:[#allocation4 + $0x28] sm:$0xff] }
  0x1b   :  { %156 = vmatpush.msra.mxu2 %v121_v17  ;;  %v63_v45 = vperm.slane %v61_v43, 0  ;;  %v64_v49 = vperm.slane %v61_v43, 1  ;;  %v194_v55 = vld [vmem:[#allocation4 + $0x20] sm:$0xff]  ;;  %v193_v56 = vld [vmem:[#allocation4 + $0x18] sm:$0xff]  ;;  %v192_v57 = vld [vmem:[#allocation4 + $0x10] sm:$0xff] }
  0x1c   :  { %176 = vmatpush.msra.mxu3 %v137_v18  ;;  %212 = vmatpush.msra.mxu0 %v203_v37  ;;  %v191_v58 = vld [vmem:[#allocation4 + $0x8] sm:$0xff]  ;;  %v190_v59 = vld [vmem:[#allocation4] sm:$0xff] }
  0x1d   :  { %157 = vmatpush.msra.mxu2 %v120_v19  ;;  %v245_v60 = vld [vmem:[%s378_s4] ss:$0 sm:$0xff] }
  0x1e   :  { %177 = vmatpush.msra.mxu3 %v136_v20  ;;  %213 = vmatpush.msra.mxu0 %v202_v38  ;;  %v246_v2 = vld [vmem:[%s380_s6] ss:$0 sm:$0xff] }
  0x1f   :  { %158 = vmatpush.msra.mxu2 %v119_v21 }
  0x20   :  { %178 = vmatpush.msra.mxu3 %v135_v26  ;;  %214 = vmatpush.msra.mxu0 %v201_v39 }
  0x21   :  { %159 = vmatpush.msra.mxu2 %v118_v22 }
  0x22   :  { %179 = vmatpush.msra.mxu3 %v134_v28  ;;  %215 = vmatpush.msra.mxu0 %v200_v40 }
  0x23   :  { %160 = vmatpush.msra.mxu2 %v117_v23 }
  0x24   :  { %180 = vmatpush.msra.mxu3 %v133_v30  ;;  %216 = vmatpush.msra.mxu0 %v199_v41 }
  0x25   :  { %161 = vmatpush.msra.mxu2 %v116_v24 }
  0x26   :  { %181 = vmatpush.msra.mxu3 %v132_v31  ;;  %217 = vmatpush.msra.mxu0 %v198_v42 }
  0x27   :  { %162 = vmatpush.msra.mxu2 %v115_v25 }
  0x28   :  { %182 = vmatpush.msra.mxu3 %v131_v32  ;;  %218 = vmatpush.msra.mxu0 %v197_v44 }
  0x29   :  { %163 = vmatpush.msra.mxu2 %v114_v27 }
  0x2a   :  { %183 = vmatpush.msra.mxu3 %v130_v33  ;;  %219 = vmatpush.msra.mxu0 %v196_v53 }
  0x2b   :  { %164 = vmatpush.msra.mxu2 %v113_v29 }
  0x2c   :  { %184 = vmatpush.msra.mxu3 %v129_v34  ;;  %220 = vmatpush.msra.mxu0 %v195_v54 }
  0x2e   :  { %221 = vmatpush.msra.mxu0 %v194_v55 }
  0x30   :  { %222 = vmatpush.msra.mxu0 %v193_v56 }
  0x32   :  { %223 = vmatpush.msra.mxu0 %v192_v57 }
  0x34   :  { %224 = vmatpush.msra.mxu0 %v191_v58 }
  0x36   :  { %225 = vmatpush.msra.mxu0 %v190_v59 }
  0x8a   :  { %v88_v46 = vpop.f32.mrf.mxu1 }
  0x8b   :  { %v89_v47 = vadd.f32 %v88_v46, %v63_v45 }
  0x8d   :  { %v111_v48 = vmax.f32 %v89_v47, 0.0 }
  0x8f   :  { %165 = vmatmul.f32.vlgmr.msra.gmra.mxu2 %v111_v48 }
  0x92   :  { %v108_v50 = vpop.f32.mrf.mxu1 }
  0x93   :  { %v109_v51 = vadd.f32 %v108_v50, %v64_v49 }
  0x95   :  { %v112_v52 = vmax.f32 %v109_v51, 0.0 }
  0x97   :  { %185 = vmatmul.f32.vlgmr.msra.gmra.mxu3 %v112_v52 }
 0x112   :  { %v166_v61 = vpop.f32.mrf.mxu2 }
 0x113   :  { %v167_v62 = vadd.f32 %v245_v60, %v166_v61 }
 0x11a   :  { %v186_v63 = vpop.f32.mrf.mxu3 }
 0x11b   :  { %v187_v0 = vadd.f32 %v186_v63, %v167_v62 }
 0x11d   :  { %v189_v1 = vmax.f32 %v187_v0, 0.0 }
 0x11f   :  { %226 = vmatmul.f32.vlgmr.msra.gmra.mxu0 %v189_v1 }
 0x19c   :  { %v227_v3 = vpop.f32.mrf.mxu0 }
 0x19d   :  { %v228_v4 = vadd.f32 %v246_v2, %v227_v3 }
 0x19f   :  { %247 = vtanh.f32 %v228_v4 }
 0x1a5   :  { %v248_v5 = vpop.eup %247 }
 0x1a6   :  { %v231_v6 = vmul.f32 2.0, %v248_v5 }
 0x1a8   :  { %232 = vst [vmem:[%s381_s7] sm:$0xff] %v231_v6 }
 0x1a9   :  { %237 = vsyncpa [#allocation3], 1 }
 0x1aa   :  { %238 = vsyncpa [#allocation5], 1 }

</bundles_post_ra>
